<compile_context>
chip_gen: v6e
topology: v6e:2x2x1
jax: 0.10.0
libtpu: 0.0.40
codegen_flags: <defaults>
</compile_context>

<pallas_src>
import functools

import jax
import jax.numpy as jnp
from jax.experimental import pallas as pl
from jax.experimental.pallas import tpu as pltpu

AA_LETTERS = '-ACDEFGHIKLMNPQRSTVWYX'
VOCAB_SIZE = len(AA_LETTERS)      # 22
EMBED_DIM = 32

PACK = 4                          # tokens packed per stored row: 4 * 32 = 128 lanes
LANES = PACK * EMBED_DIM          # 128


def _round_up(x, m):
    return (x + m - 1) // m * m


def _embed_kernel(idx_ref, table_ref, out_ref, *, chunk_rows, v_pad):
    # idx_ref:   (TN, PACK)            int32  packed token ids
    # table_ref: (PACK*v_pad, LANES)   f32    block-diagonal table (VMEM-resident)
    # out_ref:   (TN, LANES)           f32    4 embeddings per row, lane-dense
    n_rows = out_ref.shape[0]
    kdim = table_ref.shape[0]                      # PACK * v_pad

    # Loop-invariant values: hoist out of the (unrolled) chunk loop.
    table = table_ref[...]                                               # (K, 128)
    pos = jax.lax.broadcasted_iota(jnp.int32, (chunk_rows, PACK), 1)     # (C, PACK)
    iota = jax.lax.broadcasted_iota(jnp.int32, (chunk_rows, kdim), 1)    # (C, K)

    def body(c, carry):
        start = pl.multiple_of(c * chunk_rows, chunk_rows)
        idx = idx_ref[pl.ds(start, chunk_rows), :]                       # (C, PACK)
        blk = idx + pos * v_pad                                          # (C, PACK)
        # Multi-hot: exactly one 1.0 per packed slot; slots hit disjoint column
        # blocks of the block-diagonal table, so the matmul is an exact gather.
        mh = (iota == blk[:, 0:1]).astype(jnp.float32)
        for j in range(1, PACK):
            mh = mh + (iota == blk[:, j:j + 1]).astype(jnp.float32)
        out_ref[pl.ds(start, chunk_rows), :] = jnp.dot(
            mh, table, preferred_element_type=jnp.float32)
        return carry

    jax.lax.fori_loop(0, n_rows // chunk_rows, body, 0, unroll=True)


def _block_diag_table(table, v_pad):
    """(V, E) -> block-diagonal (PACK*v_pad, PACK*E), extra rows zero."""
    v, e = table.shape
    tpad = jnp.zeros((v_pad, e), jnp.float32).at[:v, :].set(table.astype(jnp.float32))
    big = jnp.zeros((PACK * v_pad, PACK * e), jnp.float32)
    for j in range(PACK):
        big = big.at[j * v_pad:(j + 1) * v_pad, j * e:(j + 1) * e].set(tpad)
    return big


def tcr_embedding(x, table, *, block_rows=1024, chunk_rows=128):
    """Embedding lookup. x: [B, S] ints, table: [V, 32] f32 -> [B, S, 32] f32."""
    b, s = x.shape
    v, e = table.shape
    assert PACK * e == LANES, "kernel assumes embed_dim == 32 (4 tokens / 128 lanes)"
    n = b * s

    chunk_rows = max(8, chunk_rows)
    block_rows = max(chunk_rows, block_rows)

    rows = pl.cdiv(n, PACK)                                    # packed rows needed
    block_eff = min(block_rows, _round_up(rows, chunk_rows))   # shrink for tiny inputs
    block_eff = _round_up(block_eff, chunk_rows)               # chunk divides block
    rows_padded = _round_up(rows, block_eff)
    n_padded = rows_padded * PACK

    # Clamp ids (torch would error on out-of-range) and pad with padding_idx=0;
    # padded rows are trimmed after the kernel.
    idx = jnp.clip(x.reshape(-1).astype(jnp.int32), 0, v - 1)
    idx = jnp.concatenate([idx, jnp.zeros((n_padded - n,), jnp.int32)])
    idx = idx.reshape(rows_padded, PACK)

    v_pad = max(32, _round_up(v, 8))                 # sublane-aligned vocab padding
    big_table = _block_diag_table(table, v_pad)      # (PACK*v_pad, 128) ~64 KiB

    kernel = functools.partial(_embed_kernel, chunk_rows=chunk_rows, v_pad=v_pad)

    out = pl.pallas_call(
        kernel,
        out_shape=jax.ShapeDtypeStruct((rows_padded, LANES), jnp.float32),
        grid=(rows_padded // block_eff,),
        in_specs=[
            pl.BlockSpec((block_eff, PACK), lambda i: (i, 0)),       # packed ids
            pl.BlockSpec((PACK * v_pad, LANES), lambda i: (0, 0)),   # table (resident)
        ],
        out_specs=pl.BlockSpec((block_eff, LANES), lambda i: (i, 0)),
        compiler_params=pltpu.CompilerParams(
            dimension_semantics=("parallel",),        # megacore-shardable on v7x
            vmem_limit_bytes=32 * 1024 * 1024,        # explicit; safe on 64 MiB v7x
        ),
    )(idx, big_table)

    # (rows_padded, 4*E) -> (rows_padded*4, E) is a contiguous (free) reshape.
    out_flat = out.reshape(rows_padded * PACK, e)[:n]
    return out_flat.reshape(b, s, e)


def init_embedding_table(key, vocab_size=VOCAB_SIZE, embed_dim=EMBED_DIM):
    # nn.Embedding default init: N(0, 1); padding_idx=0 row zeroed.
    table = jax.random.normal(key, (vocab_size, embed_dim), dtype=jnp.float32)
    table = table.at[0].set(0.0)
    return table


if __name__ == "__main__":
    key = jax.random.PRNGKey(0)
    k_tab, k_idx = jax.random.split(key)

    batch_size, seq_len = 2, 8
    table = init_embedding_table(k_tab)

    # deterministic small integer token ids in [0, VOCAB_SIZE); force one pad token
    x = jax.random.randint(k_idx, (batch_size, seq_len), 0, VOCAB_SIZE, dtype=jnp.int32)
    x = x.at[0, 0].set(0)   # padding_idx position -> must embed to all zeros

    out = tcr_embedding(x, table)
    out = jax.block_until_ready(out)

    # sanity check against plain JAX gather (same semantics as torch embedding)
    ref = jnp.take(table, x, axis=0)
    assert out.shape == (batch_size, seq_len, EMBED_DIM)
    assert jnp.allclose(out, ref), "mismatch vs reference gather"
    assert jnp.all(out[0, 0] == 0.0), "padding_idx row must embed to zeros"

    print("KERNEL_OK")
</pallas_src>

<mosaic_0001>
module attributes {stable_mosaic.version = 11 : i64} {
  func.func @_embed_kernel(%arg0: i32, %arg1: memref<128x4xi32, #tpu.memory_space<vmem>>, %arg2: memref<128x128xf32, #tpu.memory_space<vmem>>, %arg3: memref<128x128xf32, #tpu.memory_space<vmem>>) attributes {dimension_semantics = [#tpu.dimension_semantics<parallel>], iteration_bounds = array<i64: 1>, scalar_prefetch = 0 : i64, scratch_operands = 0 : i64, tpu.core_type = #tpu.core_type<tc>, window_params = [{transform_indices = @transform_0, window_bounds = array<i64: 128, 4>}, {pipeline_mode = #tpu.pipeline_mode<synchronous>, transform_indices = @transform_1, window_bounds = array<i64: 128, 128>}, {transform_indices = @transform_2, window_bounds = array<i64: 128, 128>}]} {
    %c0 = arith.constant 0 : index
    %c0_0 = arith.constant 0 : index
    %0 = vector.load %arg2[%c0, %c0_0] : memref<128x128xf32, #tpu.memory_space<vmem>>, vector<128x128xf32>
    %1 = tpu.iota {dimensions = array<i32: 1>} : vector<128x4xi32>
    %2 = tpu.iota {dimensions = array<i32: 1>} : vector<128x128xi32>
    %c0_i32 = arith.constant 0 : i32
    %c128_i32 = arith.constant 128 : i32
    %3 = arith.muli %c0_i32, %c128_i32 : i32
    %4 = tpu.assume_multiple %3, 128 : i32
    %5 = arith.index_cast %4 : i32 to index
    %c0_1 = arith.constant 0 : index
    %6 = vector.load %arg1[%5, %c0_1] : memref<128x4xi32, #tpu.memory_space<vmem>>, vector<128x4xi32>
    %c32_i32 = arith.constant 32 : i32
    %7 = vector.broadcast %c32_i32 : i32 to vector<128x4xi32>
    %8 = arith.muli %1, %7 : vector<128x4xi32>
    %9 = arith.addi %6, %8 : vector<128x4xi32>
    %10 = vector.extract_strided_slice %9 {offsets = [0, 0], sizes = [128, 1], strides = [1, 1]} : vector<128x4xi32> to vector<128x1xi32>
    %11 = vector.broadcast %10 : vector<128x1xi32> to vector<128x128xi32>
    %12 = arith.cmpi eq, %2, %11 : vector<128x128xi32>
    %13 = arith.extui %12 : vector<128x128xi1> to vector<128x128xi32>
    %14 = arith.sitofp %13 : vector<128x128xi32> to vector<128x128xf32>
    %15 = vector.extract_strided_slice %9 {offsets = [0, 1], sizes = [128, 1], strides = [1, 1]} : vector<128x4xi32> to vector<128x1xi32>
    %16 = vector.broadcast %15 : vector<128x1xi32> to vector<128x128xi32>
    %17 = arith.cmpi eq, %2, %16 : vector<128x128xi32>
    %18 = arith.extui %17 : vector<128x128xi1> to vector<128x128xi32>
    %19 = arith.sitofp %18 : vector<128x128xi32> to vector<128x128xf32>
    %20 = arith.addf %14, %19 : vector<128x128xf32>
    %21 = vector.extract_strided_slice %9 {offsets = [0, 2], sizes = [128, 1], strides = [1, 1]} : vector<128x4xi32> to vector<128x1xi32>
    %22 = vector.broadcast %21 : vector<128x1xi32> to vector<128x128xi32>
    %23 = arith.cmpi eq, %2, %22 : vector<128x128xi32>
    %24 = arith.extui %23 : vector<128x128xi1> to vector<128x128xi32>
    %25 = arith.sitofp %24 : vector<128x128xi32> to vector<128x128xf32>
    %26 = arith.addf %20, %25 : vector<128x128xf32>
    %27 = vector.extract_strided_slice %9 {offsets = [0, 3], sizes = [128, 1], strides = [1, 1]} : vector<128x4xi32> to vector<128x1xi32>
    %28 = vector.broadcast %27 : vector<128x1xi32> to vector<128x128xi32>
    %29 = arith.cmpi eq, %2, %28 : vector<128x128xi32>
    %30 = arith.extui %29 : vector<128x128xi1> to vector<128x128xi32>
    %31 = arith.sitofp %30 : vector<128x128xi32> to vector<128x128xf32>
    %32 = arith.addf %26, %31 : vector<128x128xf32>
    %cst = arith.constant dense<0.000000e+00> : vector<128x128xf32>
    %33 = tpu.matmul %32, %0, %cst {dimension_numbers = #tpu.dot_dimension_numbers<[1], [0], [0], [1], [0, 0, 1, 1], [], []>} : vector<128x128xf32>, vector<128x128xf32>, vector<128x128xf32> -> vector<128x128xf32>
    %34 = arith.index_cast %4 : i32 to index
    %c0_2 = arith.constant 0 : index
    %35 = vector.load %arg3[%34, %c0_2] : memref<128x128xf32, #tpu.memory_space<vmem>>, vector<128x128xf32>
    tpu.vector_store %arg3[%34, %c0_2], %33 {strides = array<i32>} : memref<128x128xf32, #tpu.memory_space<vmem>>, vector<128x128xf32>,
    %c1_i32 = arith.constant 1 : i32
    return
  }
  func.func @transform_0(%arg0: i32) -> (i32, i32) {
    %c0_i32 = arith.constant 0 : i32
    %c0_i32_0 = arith.constant 0 : i32
    return %arg0, %c0_i32 : i32, i32
  }
  func.func @transform_1(%arg0: i32) -> (i32, i32) {
    %c0_i32 = arith.constant 0 : i32
    %c0_i32_0 = arith.constant 0 : i32
    %c0_i32_1 = arith.constant 0 : i32
    return %c0_i32, %c0_i32_0 : i32, i32
  }
  func.func @transform_2(%arg0: i32) -> (i32, i32) {
    %c0_i32 = arith.constant 0 : i32
    %c0_i32_0 = arith.constant 0 : i32
    return %arg0, %c0_i32 : i32, i32
  }
}

</mosaic_0001>

<bundles_post_ra>
// kernel: tpu_custom_call.1
= control target key start
LH: loop header
LB: loop body
LE: loop exit
PB: predicated region body
PF: predicated region fallthrough
CT: control target
= control target key end

     0   :  { %v28_v0 = vlaneseq  ;;  %v917_v1 = vmov 3   ;;  %v918_v2 = vmov 1   ;;  %s1369_s0 = inlined_call_operand.vmem [shape: s32[128,4], index: 0, kind: input, shape index: {}]   ;;  %s1370_s1 = inlined_call_operand.vmem [shape: f32[128,128], index: 1, kind: input, shape index: {}]   ;;  %s1371_s2 = inlined_call_operand.hbm [shape: f32[128,128], index: 2, kind: output, shape index: {}]  }
   0x1   :  { %877 = vset.pattern.permute.xlu0 %v917_v1  ;;  %864 = vset.pattern.permute.xlu1 %v918_v2  ;;  %v32_v4 = vld [vmem:[%s1369_s0 + $0x10] sm:$0xff]  ;;  %v30_v5 = vld [vmem:[%s1369_s0] sm:$0xff]  ;;  %v33_v7 = vld [vmem:[%s1369_s0 + $0x18] sm:$0xff] }
   0x2   :  { %v942_v3 = vand.u32 127, %v28_v0  ;;  %v38_v8 = vld [vmem:[%s1369_s0 + $0x40] sm:$0xff] }
   0x4   :  { %v951_v6 = vmul.u32 32, %v942_v3 }
   0x5   :  { %7 = vsyncpa [#allocation3], 0  ;;  %v39_v13 = vld [vmem:[%s1369_s0 + $0x48] sm:$0xff]  ;;  %v919_v15 = vmov 0   ;;  %v920_v18 = vmov 2   ;;  %v42_v19 = vld [vmem:[%s1369_s0 + $0x60] sm:$0xff] }
   0x6   :  { %v960_v9 = vadd.s32 %v951_v6, %v32_v4  ;;  %v963_v10 = vadd.s32 %v951_v6, %v30_v5  ;;  %v968_v11 = vadd.s32 %v951_v6, %v33_v7  ;;  %v971_v12 = vadd.s32 %v951_v6, %v38_v8  ;;  %v31_v16 = vld [vmem:[%s1369_s0 + $0x8] sm:$0xff]  ;;  %v40_v21 = vld [vmem:[%s1369_s0 + $0x50] sm:$0xff]  ;;  %v27_v24 = vld [vmem:[%s1370_s1 + $0x78] sm:$0xff] }
   0x7   :  { %v979_v14 = vadd.s32 %v951_v6, %v39_v13  ;;  %v991_v17 = vadd.s32 %v951_v6, %v31_v16  ;;  %v1004_v20 = vadd.s32 %v951_v6, %v42_v19  ;;  %v43_v22 = vld [vmem:[%s1369_s0 + $0x68] sm:$0xff]  ;;  %v1014_v23 = vadd.s32 %v951_v6, %v40_v21  ;;  %768 = vmatprep.subr.mxu0 %v27_v24  ;;  %v36_v26 = vld [vmem:[%s1369_s0 + $0x30] sm:$0xff]  ;;  %v37_v30 = vld [vmem:[%s1369_s0 + $0x38] sm:$0xff] }
   0x8   :  { %390 = vperm.xlu0 %877, %v960_v9   ;;  %160 = vperm.xlu1 %864, %v963_v10   ;;  %v1021_v25 = vadd.s32 %v951_v6, %v43_v22  ;;  %v26_v27 = vld [vmem:[%s1370_s1 + $0x70] sm:$0xff]  ;;  %v25_v28 = vld [vmem:[%s1370_s1 + $0x68] sm:$0xff]  ;;  %v1036_v29 = vadd.s32 %v951_v6, %v36_v26  ;;  %v24_v31 = vld [vmem:[%s1370_s1 + $0x60] sm:$0xff]  ;;  %v1051_v33 = vadd.s32 %v951_v6, %v37_v30 }
   0x9   :  { %769 = vmatpush3.msra.mxu0 %v27_v24  ;;  %824 = vmatprep.subr.mxu1 %v27_v24  ;;  %v23_v32 = vld [vmem:[%s1370_s1 + $0x58] sm:$0xff]  ;;  %v22_v34 = vld [vmem:[%s1370_s1 + $0x50] sm:$0xff]  ;;  %v21_v35 = vld [vmem:[%s1370_s1 + $0x48] sm:$0xff] }
   0xa   :  { %770 = vmatprep.subr.mxu0 %v26_v27  ;;  %840 = vmatpush3.msra.mxu1 %v27_v24  ;;  %v20_v36 = vld [vmem:[%s1370_s1 + $0x40] sm:$0xff]  ;;  %v41_v37 = vld [vmem:[%s1369_s0 + $0x58] sm:$0xff]  ;;  %v18_v40 = vld [vmem:[%s1370_s1 + $0x30] sm:$0xff] }
   0xb   :  { %771 = vmatpush3.msra.mxu0 %v26_v27  ;;  %825 = vmatprep.subr.mxu1 %v26_v27  ;;  %v19_v38 = vld [vmem:[%s1370_s1 + $0x38] sm:$0xff]  ;;  %v1075_v39 = vadd.s32 %v951_v6, %v41_v37  ;;  %v17_v41 = vld [vmem:[%s1370_s1 + $0x28] sm:$0xff]  ;;  %v44_v42 = vld [vmem:[%s1369_s0 + $0x70] sm:$0xff] }
   0xc   :  { %393 = vperm.xlu0 %877, %v968_v11   ;;  %184 = vperm.xlu1 %864, %v971_v12   ;;  %v16_v43 = vld [vmem:[%s1370_s1 + $0x20] sm:$0xff]  ;;  %v1094_v44 = vadd.s32 %v951_v6, %v44_v42  ;;  %v45_v45 = vld [vmem:[%s1369_s0 + $0x78] sm:$0xff]  ;;  %v14_v48 = vld [vmem:[%s1370_s1 + $0x10] sm:$0xff] }
   0xd   :  { %772 = vmatprep.subr.mxu0 %v25_v28  ;;  %841 = vmatpush3.msra.mxu1 %v26_v27  ;;  %v15_v46 = vld [vmem:[%s1370_s1 + $0x18] sm:$0xff]  ;;  %v1106_v47 = vadd.s32 %v951_v6, %v45_v45  ;;  %v13_v49 = vld [vmem:[%s1370_s1 + $0x8] sm:$0xff]  ;;  %v12_v50 = vld [vmem:[%s1370_s1] sm:$0xff] }
   0xe   :  { %773 = vmatpush3.msra.mxu0 %v25_v28  ;;  %826 = vmatprep.subr.mxu1 %v25_v28  ;;  %v34_v51 = vld [vmem:[%s1369_s0 + $0x20] sm:$0xff]  ;;  %v35_v53 = vld [vmem:[%s1369_s0 + $0x28] sm:$0xff]  ;;  %s922_s0 = smov [#allocation2]  }
   0xf   :  { %774 = vmatprep.subr.mxu0 %v24_v31  ;;  %842 = vmatpush3.msra.mxu1 %v25_v28  ;;  %v51_v52 = vadd.s32 %v951_v6, %v34_v51  ;;  %v52_v54 = vadd.s32 %v951_v6, %v35_v53  ;;  %s661_s16 = sshll.u32 %s922_s0, 4  ;;  %s662_s16 = int_to_ptr.vmem [resolvable:$true] %s661_s16 }
  0x10   :  { %881 = vset.pattern.permute.xlu0 %v919_v15  ;;  %865 = vset.pattern.permute.xlu1 %v919_v15  ;;  %s895_s17 = scalar_lea.vmem %s662_s16, 2048  ;;  %p900_p1 = scmp.lt.s32.totalorder %s662_s16, %s662_s16 }
  0x11   :  { %64 = vperm.xlu0 %881, %v963_v10   ;;  %91 = vperm.xlu1 %865, %v979_v14   ;;  %p896_p0 = scmp.ne.s32.totalorder %s662_s16, %s895_s17  ;;  %p901_p2 = scmp.lt.s32.totalorder %s895_s17, %s895_s17 }
  0x12   :  { %775 = vmatpush3.msra.mxu0 %v24_v31  ;;  %827 = vmatprep.subr.mxu1 %v24_v31 }
  0x13   :  { %776 = vmatprep.subr.mxu0 %v23_v32  ;;  %843 = vmatpush3.msra.mxu1 %v24_v31  ;;  %p902_p3 = por %p901_p2, %p900_p1 }
  0x14   :  { %777 = vmatpush3.msra.mxu0 %v23_v32  ;;  %828 = vmatprep.subr.mxu1 %v23_v32 }
  0x15   :  { %88 = vperm.xlu0 %881, %v971_v12   ;;  %866 = vset.pattern.permute.xlu1 %v918_v2  ;;  %p903_p4 = pnand %p902_p3, %p896_p0 }
  0x16   :  { %187 = vperm.xlu1 %866, %v979_v14   ;;  %778 = vmatprep.subr.mxu0 %v22_v34 }
  0x17   :  { %779 = vmatpush3.msra.mxu0 %v22_v34  ;;  %844 = vmatpush3.msra.mxu1 %v23_v32 }
  0x18   :  { %780 = vmatprep.subr.mxu0 %v21_v35  ;;  %829 = vmatprep.subr.mxu1 %v22_v34 }
  0x19   :  { %67 = vperm.xlu0 %881, %v991_v17   ;;  %781 = vmatpush3.msra.mxu0 %v21_v35 }
  0x1a   :  { %867 = vset.pattern.permute.xlu1 %v920_v18  ;;  %782 = vmatprep.subr.mxu0 %v20_v36 }
  0x1b   :  { %272 = vperm.xlu1 %867, %v963_v10   ;;  %783 = vmatpush3.msra.mxu0 %v20_v36 }
  0x1c   :  { %784 = vmatprep.subr.mxu0 %v19_v38  ;;  %845 = vmatpush3.msra.mxu1 %v22_v34 }
  0x1d   :  { %70 = vperm.xlu0 %881, %v960_v9   ;;  %785 = vmatpush3.msra.mxu0 %v19_v38 }
  0x1e   :  { %786 = vmatprep.subr.mxu0 %v18_v40  ;;  %830 = vmatprep.subr.mxu1 %v21_v35 }
  0x1f   :  { %275 = vperm.xlu1 %867, %v991_v17   ;;  %787 = vmatpush3.msra.mxu0 %v18_v40 }
  0x20   :  { %788 = vmatprep.subr.mxu0 %v17_v41  ;;  %846 = vmatpush3.msra.mxu1 %v21_v35 }
  0x21   :  { %73 = vperm.xlu0 %881, %v968_v11   ;;  %789 = vmatpush3.msra.mxu0 %v17_v41 }
  0x22   :  { %790 = vmatprep.subr.mxu0 %v16_v43  ;;  %831 = vmatprep.subr.mxu1 %v20_v36 }
  0x23   :  { %299 = vperm.xlu1 %867, %v979_v14   ;;  %791 = vmatpush3.msra.mxu0 %v16_v43 }
  0x24   :  { %847 = vmatpush3.msra.mxu1 %v20_v36  ;;  %792 = vmatprep.subr.mxu0 %v15_v46 }
  0x25   :  { %100 = vperm.xlu0 %881, %v1004_v20   ;;  %832 = vmatprep.subr.mxu1 %v19_v38 }
  0x26   :  { %793 = vmatpush3.msra.mxu0 %v15_v46  ;;  %848 = vmatpush3.msra.mxu1 %v19_v38 }
  0x27   :  { %868 = vset.pattern.permute.xlu1 %v919_v15  ;;  %794 = vmatprep.subr.mxu0 %v14_v48 }
  0x28   :  { %94 = vperm.xlu1 %868, %v1014_v23   ;;  %833 = vmatprep.subr.mxu1 %v18_v40 }
  0x29   :  { %103 = vperm.xlu0 %881, %v1021_v25   ;;  %795 = vmatpush3.msra.mxu0 %v14_v48 }
  0x2a   :  { %849 = vmatpush3.msra.mxu1 %v18_v40  ;;  %796 = vmatprep.subr.mxu0 %v13_v49 }
  0x2b   :  { %834 = vmatprep.subr.mxu1 %v17_v41  ;;  %797 = vmatpush3.msra.mxu0 %v13_v49 }
  0x2c   :  { %869 = vset.pattern.permute.xlu1 %v918_v2  ;;  %850 = vmatpush3.msra.mxu1 %v17_v41 }
  0x2d   :  { %82 = vperm.xlu0 %881, %v1036_v29   ;;  %166 = vperm.xlu1 %869, %v960_v9  }
  0x2e   :  { %798 = vmatprep.subr.mxu0 %v12_v50  ;;  %835 = vmatprep.subr.mxu1 %v16_v43 }
  0x2f   :  { %799 = vmatpush3.msra.mxu0 %v12_v50  ;;  %851 = vmatpush3.msra.mxu1 %v16_v43 }
  0x30   :  { %836 = vmatprep.subr.mxu1 %v15_v46 }
  0x31   :  { %85 = vperm.xlu0 %881, %v1051_v33   ;;  %870 = vset.pattern.permute.xlu1 %v917_v1 }
  0x32   :  { %384 = vperm.xlu1 %870, %v963_v10   ;;  %852 = vmatpush3.msra.mxu1 %v15_v46 }
  0x33   :  { %837 = vmatprep.subr.mxu1 %v14_v48 }
  0x34   :  { %853 = vmatpush3.msra.mxu1 %v14_v48 }
  0x35   :  { %887 = vset.pattern.permute.xlu0 %v918_v2  ;;  %838 = vmatprep.subr.mxu1 %v13_v49 }
  0x36   :  { %163 = vperm.xlu0 %887, %v991_v17   ;;  %408 = vperm.xlu1 %870, %v971_v12  }
  0x37   :  { %854 = vmatpush3.msra.mxu1 %v13_v49 }
  0x38   :  { %839 = vmatprep.subr.mxu1 %v12_v50 }
  0x39   :  { %855 = vmatpush3.msra.mxu1 %v12_v50 }
  0x3a   :  { %190 = vperm.xlu0 %887, %v1014_v23   ;;  %871 = vset.pattern.permute.xlu1 %v919_v15 }
  0x3b   :  { %97 = vperm.xlu1 %871, %v1075_v39  }
  0x3e   :  { %193 = vperm.xlu0 %887, %v1075_v39  }
  0x3f   :  { %872 = vset.pattern.permute.xlu1 %v918_v2 }
  0x40   :  { %169 = vperm.xlu1 %872, %v968_v11  }
  0x42   :  { %202 = vperm.xlu0 %887, %v1094_v44  }
  0x44   :  { %873 = vset.pattern.permute.xlu1 %v917_v1 }
  0x45   :  { %387 = vperm.xlu1 %873, %v991_v17  }
  0x46   :  { %205 = vperm.xlu0 %887, %v1106_v47  }
  0x49   :  { %411 = vperm.xlu1 %873, %v979_v14  }
  0x4a   :  { %890 = vset.pattern.permute.xlu0 %v920_v18 }
  0x4b   :  { %296 = vperm.xlu0 %890, %v971_v12  }
  0x4d   :  { %874 = vset.pattern.permute.xlu1 %v920_v18 }
  0x4e   :  { %302 = vperm.xlu1 %874, %v1014_v23  }
  0x4f   :  { %278 = vperm.xlu0 %890, %v960_v9  }
  0x52   :  { %281 = vperm.xlu1 %874, %v968_v11  }
  0x53   :  { %305 = vperm.xlu0 %890, %v1075_v39  }
  0x56   :  { %875 = vset.pattern.permute.xlu1 %v919_v15 }
  0x57   :  { %76 = vperm.xlu1 %875, %v51_v52   ;;  %308 = vperm.xlu0 %890, %v1004_v20  }
  0x5b   :  { %876 = vset.pattern.permute.xlu1 %v918_v2  ;;  %290 = vperm.xlu0 %890, %v1036_v29  }
  0x5c   :  { %172 = vperm.xlu1 %876, %v51_v52  }
  0x5f   :  { %317 = vperm.xlu0 %890, %v1106_v47  }
  0x60   :  { %196 = vperm.xlu1 %876, %v1004_v20  }
  0x63   :  { %894 = vset.pattern.permute.xlu0 %v917_v1 }
  0x64   :  { %878 = vset.pattern.permute.xlu1 %v917_v1  ;;  %426 = vperm.xlu0 %894, %v1094_v44  }
  0x65   :  { %414 = vperm.xlu1 %878, %v1014_v23  }
  0x69   :  { %879 = vset.pattern.permute.xlu1 %v919_v15 }
  0x6a   :  { %79 = vperm.xlu1 %879, %v52_v54  }
  0x6e   :  { %880 = vset.pattern.permute.xlu1 %v918_v2 }
  0x6f   :  { %175 = vperm.xlu1 %880, %v52_v54  }
  0x73   :  { %199 = vperm.xlu1 %880, %v1021_v25  }
  0x77   :  { %882 = vset.pattern.permute.xlu1 %v917_v1 }
  0x78   :  { %417 = vperm.xlu1 %882, %v1075_v39  }
  0x7c   :  { %883 = vset.pattern.permute.xlu1 %v920_v18 }
  0x7d   :  { %284 = vperm.xlu1 %883, %v51_v52  }
  0x81   :  { %287 = vperm.xlu1 %883, %v52_v54  }
  0x83   :  { %v161_v55 = vpop.permute.xlu1 %160  ;;  %v1152_v56 = vpop.permute.xlu0 %390 }
  0x84   :  { %vm207_vm1 = vcmp.eq.s32.totalorder %v942_v3, %v161_v55 }
  0x85   :  { %311 = vperm.xlu1 %883, %v1021_v25  }
  0x87   :  { %v1155_v57 = vpop.permute.xlu1 %184  ;;  %v1157_v58 = vpop.permute.xlu0 %393 }
  0x88   :  { %vm215_vm10 = vcmp.eq.s32.totalorder %v942_v3, %v1155_v57 }
  0x89   :  { %884 = vset.pattern.permute.xlu1 %v919_v15 }
  0x8a   :  { %106 = vperm.xlu1 %884, %v1094_v44  }
  0x8c   :  { %v65_v59 = vpop.permute.xlu0 %64  ;;  %v1161_v60 = vpop.permute.xlu1 %91 }
  0x8d   :  { %vm111_vm0 = vcmp.eq.s32.totalorder %v942_v3, %v65_v59  ;;  %vm120_vm11 = vcmp.eq.s32.totalorder %v942_v3, %v1161_v60 }
  0x8e   :  { %885 = vset.pattern.permute.xlu1 %v918_v2 }
  0x8f   :  { %178 = vperm.xlu1 %885, %v1036_v29  }
  0x90   :  { %v1165_v61 = vpop.permute.xlu0 %88 }
  0x91   :  { %v1167_v62 = vpop.permute.xlu1 %187  ;;  %vm119_vm7 = vcmp.eq.s32.totalorder %v942_v3, %v1165_v61 }
  0x92   :  { %vm216_vm8 = vcmp.eq.s32.totalorder %v942_v3, %v1167_v62 }
  0x93   :  { %886 = vset.pattern.permute.xlu1 %v917_v1 }
  0x94   :  { %396 = vperm.xlu1 %886, %v51_v52   ;;  %v68_v63 = vpop.permute.xlu0 %67 }
  0x95   :  { %vm112_vm4 = vcmp.eq.s32.totalorder %v942_v3, %v68_v63 }
  0x96   :  { %v273_v0 = vpop.permute.xlu1 %272 }
  0x97   :  { %vm319_vm2 = vcmp.eq.s32.totalorder %v942_v3, %v273_v0 }
  0x98   :  { %420 = vperm.xlu1 %886, %v1004_v20   ;;  %v1171_v4 = vpop.permute.xlu0 %70 }
  0x99   :  { %vm113_vm13 = vcmp.eq.s32.totalorder %v942_v3, %v1171_v4 }
  0x9a   :  { %v276_v5 = vpop.permute.xlu1 %275 }
  0x9b   :  { %vm320_vm6 = vcmp.eq.s32.totalorder %v942_v3, %v276_v5 }
  0x9c   :  { %888 = vset.pattern.permute.xlu1 %v919_v15  ;;  %v1174_v6 = vpop.permute.xlu0 %73 }
  0x9d   :  { %109 = vperm.xlu1 %888, %v1106_v47  }
  0x9e   :  { %v1177_v7 = vpop.permute.xlu1 %299 }
  0x9f   :  { %vm328_vm12 = vcmp.eq.s32.totalorder %v942_v3, %v1177_v7 }
  0xa0   :  { %v1179_v8 = vpop.permute.xlu0 %100 }
  0xa1   :  { %889 = vset.pattern.permute.xlu1 %v918_v2  ;;  %v921_v2 = vmov 0.0  }
  0xa2   :  { %181 = vperm.xlu1 %889, %v1051_v33   ;;  %v672_v13 = vsel %vm111_vm0, 1.0, %v921_v2  ;;  %v688_v14 = vsel %vm207_vm1, 1.0, %v921_v2  ;;  %v704_v15 = vsel %vm319_vm2, 1.0, %v921_v2  ;;  %v673_v27 = vsel %vm112_vm4, 1.0, %v921_v2 }
  0xa3   :  { %v1183_v9 = vpop.permute.xlu1 %94  ;;  %v255_v16 = vadd.f32 %v688_v14, %v672_v13  ;;  %v680_v36 = vsel %vm119_vm7, 1.0, %v921_v2  ;;  %v697_v37 = vsel %vm216_vm8, 1.0, %v921_v2  ;;  %v696_v40 = vsel %vm215_vm10, 1.0, %v921_v2 }
  0xa4   :  { %v1185_v10 = vpop.permute.xlu0 %103  ;;  %v681_v41 = vsel %vm120_vm11, 1.0, %v921_v2  ;;  %v263_v42 = vadd.f32 %v696_v40, %v680_v36  ;;  %vm114_vm0 = vcmp.eq.s32.totalorder %v942_v3, %v1174_v6  ;;  %v713_v45 = vsel %vm328_vm12, 1.0, %v921_v2 }
  0xa5   :  { %v367_v20 = vadd.f32 %v704_v15, %v255_v16  ;;  %v264_v43 = vadd.f32 %v697_v37, %v681_v41  ;;  %v674_v46 = vsel %vm113_vm13, 1.0, %v921_v2  ;;  %vm433_vm4 = vcmp.eq.s32.totalorder %v942_v3, %v1152_v56 }
  0xa6   :  { %891 = vset.pattern.permute.xlu1 %v917_v1  ;;  %v675_v52 = vsel %vm114_vm0, 1.0, %v921_v2  ;;  %v722_v61 = vsel %vm433_vm4, 1.0, %v921_v2 }
  0xa7   :  { %399 = vperm.xlu1 %891, %v52_v54   ;;  %v376_v53 = vadd.f32 %v713_v45, %v264_v43 }
  0xa8   :  { %v1191_v11 = vpop.permute.xlu1 %166  ;;  %v1193_v12 = vpop.permute.xlu0 %82 }
  0xa9   :  { %vm209_vm14 = vcmp.eq.s32.totalorder %v942_v3, %v1191_v11 }
  0xab   :  { %423 = vperm.xlu1 %891, %v1021_v25  }
  0xac   :  { %v1199_v17 = vpop.permute.xlu0 %85 }
  0xad   :  { %v385_v19 = vpop.permute.xlu1 %384 }
  0xae   :  { %vm431_vm3 = vcmp.eq.s32.totalorder %v942_v3, %v385_v19 }
  0xaf   :  { %892 = vset.pattern.permute.xlu1 %v920_v18  ;;  %v720_v21 = vsel %vm431_vm3, 1.0, %v921_v2 }
  0xb0   :  { %314 = vperm.xlu1 %892, %v1094_v44   ;;  %v479_v22 = vadd.f32 %v720_v21, %v367_v20 }
  0xb1   :  { %v164_v23 = vpop.permute.xlu0 %163  ;;  %v409_v24 = vpop.permute.xlu1 %408 }
  0xb2   :  { %800 = vmatprep.mubr.f32.mxu0 %v479_v22  ;;  %vm208_vm5 = vcmp.eq.s32.totalorder %v942_v3, %v164_v23  ;;  %vm439_vm1 = vcmp.eq.s32.totalorder %v942_v3, %v409_v24 }
  0xb3   :  { %v689_v28 = vsel %vm208_vm5, 1.0, %v921_v2  ;;  %v728_v55 = vsel %vm439_vm1, 1.0, %v921_v2  ;;  %vm123_vm1 = vcmp.eq.s32.totalorder %v942_v3, %v1179_v8 }
  0xb4   :  { %293 = vperm.xlu1 %892, %v1051_v33   ;;  %v256_v31 = vadd.f32 %v689_v28, %v673_v27 }
  0xb5   :  { %v1206_v25 = vpop.permute.xlu0 %190 }
  0xb6   :  { %v1208_v26 = vpop.permute.xlu1 %97  ;;  %vm217_vm8 = vcmp.eq.s32.totalorder %v942_v3, %v1206_v25 }
  0xb7   :  { %v698_v16 = vsel %vm217_vm8, 1.0, %v921_v2  ;;  %vm122_vm13 = vcmp.eq.s32.totalorder %v942_v3, %v1208_v26 }
  0xb8   :  { %893 = vset.pattern.permute.xlu1 %v917_v1  ;;  %v705_v1 = vsel %vm320_vm6, 1.0, %v921_v2  ;;  %vm434_vm6 = vcmp.eq.s32.totalorder %v942_v3, %v1157_v58 }
  0xb9   :  { %v1213_v18 = vpop.permute.xlu0 %193  ;;  %402 = vperm.xlu1 %893, %v1036_v29   ;;  %v368_v34 = vadd.f32 %v705_v1, %v256_v31  ;;  %v723_v5 = vsel %vm434_vm6, 1.0, %v921_v2  ;;  %v683_v1 = vsel %vm122_vm13, 1.0, %v921_v2 }
  0xba   :  { %vm218_vm12 = vcmp.eq.s32.totalorder %v942_v3, %v1213_v18 }
  0xbb   :  { %v170_v30 = vpop.permute.xlu1 %169  ;;  %v699_v31 = vsel %vm218_vm12, 1.0, %v921_v2  ;;  %vm124_vm12 = vcmp.eq.s32.totalorder %v942_v3, %v1185_v10 }
  0xbc   :  { %vm210_vm3 = vcmp.eq.s32.totalorder %v942_v3, %v170_v30 }
  0xbd   :  { %405 = vperm.xlu1 %893, %v1051_v33   ;;  %v1220_v32 = vpop.permute.xlu0 %202  ;;  %v691_v59 = vsel %vm210_vm3, 1.0, %v921_v2 }
  0xbe   :  { %v258_v4 = vadd.f32 %v691_v59, %v675_v52 }
  0xc0   :  { %v388_v29 = vpop.permute.xlu1 %387 }
  0xc1   :  { %vm432_vm9 = vcmp.eq.s32.totalorder %v942_v3, %v388_v29  ;;  %429 = vperm.xlu1 %893, %v1106_v47   ;;  %v1229_v35 = vpop.permute.xlu0 %205  ;;  %v690_v47 = vsel %vm209_vm14, 1.0, %v921_v2 }
  0xc2   :  { %v721_v33 = vsel %vm432_vm9, 1.0, %v921_v2  ;;  %v257_v57 = vadd.f32 %v690_v47, %v674_v46  ;;  %vm121_vm9 = vcmp.eq.s32.totalorder %v942_v3, %v1183_v9 }
  0xc3   :  { %v480_v38 = vadd.f32 %v721_v33, %v368_v34  ;;  %v682_v19 = vsel %vm121_vm9, 1.0, %v921_v2  ;;  %v266_v34 = vadd.f32 %v699_v31, %v683_v1 }
  0xc4   :  { %v412_v39 = vpop.permute.xlu1 %411  ;;  %v265_v21 = vadd.f32 %v698_v16, %v682_v19 }
  0xc5   :  { %801 = vmatmul.mubr.f32.vlgmr.msra.gmra.mxu0 %v480_v38  ;;  %vm440_vm15 = vcmp.eq.s32.totalorder %v942_v3, %v412_v39 }
  0xc6   :  { %v297_v44 = vpop.permute.xlu0 %296  ;;  %v729_v49 = vsel %vm440_vm15, 1.0, %v921_v2 }
  0xc7   :  { %vm327_vm2 = vcmp.eq.s32.totalorder %v942_v3, %v297_v44  ;;  %v488_v56 = vadd.f32 %v729_v49, %v376_v53  ;;  %v684_v44 = vsel %vm123_vm1, 1.0, %v921_v2 }
  0xc8   :  { %v712_v48 = vsel %vm327_vm2, 1.0, %v921_v2 }
  0xc9   :  { %v303_v50 = vpop.permute.xlu1 %302  ;;  %v375_v51 = vadd.f32 %v712_v48, %v263_v42 }
  0xca   :  { %v279_v54 = vpop.permute.xlu0 %278  ;;  %vm329_vm10 = vcmp.eq.s32.totalorder %v942_v3, %v303_v50 }
  0xcb   :  { %vm321_vm5 = vcmp.eq.s32.totalorder %v942_v3, %v279_v54  ;;  %v487_v60 = vadd.f32 %v728_v55, %v375_v51  ;;  %v714_v20 = vsel %vm329_vm10, 1.0, %v921_v2 }
  0xcc   :  { %v706_v62 = vsel %vm321_vm5, 1.0, %v921_v2  ;;  %v377_v23 = vadd.f32 %v714_v20, %v265_v21 }
  0xcd   :  { %v369_v63 = vadd.f32 %v706_v62, %v257_v57  ;;  %812 = vmatprep.mubr.f32.mxu1 %v487_v60  ;;  %v282_v0 = vpop.permute.xlu1 %281 }
  0xce   :  { %vm322_vm7 = vcmp.eq.s32.totalorder %v942_v3, %v282_v0  ;;  %813 = vmatmul.mubr.f32.vlgmr.msra.gmra.mxu1 %v488_v56  ;;  %v306_v28 = vpop.permute.xlu0 %305 }
  0xcf   :  { %v707_v6 = vsel %vm322_vm7, 1.0, %v921_v2  ;;  %v481_v7 = vadd.f32 %v722_v61, %v369_v63  ;;  %vm330_vm14 = vcmp.eq.s32.totalorder %v942_v3, %v306_v28 }
  0xd0   :  { %v370_v11 = vadd.f32 %v707_v6, %v258_v4  ;;  %v715_v29 = vsel %vm330_vm14, 1.0, %v921_v2 }
  0xd1   :  { %803 = vmatprep.mubr.f32.mxu0 %v481_v7  ;;  %v378_v36 = vadd.f32 %v715_v29, %v266_v34 }
  0xd2   :  { %v77_v13 = vpop.permute.xlu1 %76  ;;  %v482_v14 = vadd.f32 %v723_v5, %v370_v11  ;;  %v309_v43 = vpop.permute.xlu0 %308 }
  0xd3   :  { %vm115_vm2 = vcmp.eq.s32.totalorder %v942_v3, %v77_v13  ;;  %vm331_vm5 = vcmp.eq.s32.totalorder %v942_v3, %v309_v43  ;;  %v685_v13 = vsel %vm124_vm12, 1.0, %v921_v2 }
  0xd4   :  { %804 = vmatmul.mubr.f32.gmra.mxu0 %v482_v14  ;;  %v676_v45 = vsel %vm115_vm2, 1.0, %v921_v2  ;;  %v716_v51 = vsel %vm331_vm5, 1.0, %v921_v2  ;;  %vm117_vm5 = vcmp.eq.s32.totalorder %v942_v3, %v1193_v12 }
  0xd5   :  { %v678_v1 = vsel %vm117_vm5, 1.0, %v921_v2 }
  0xd6   :  { %v291_v62 = vpop.permute.xlu0 %290 }
  0xd7   :  { %v173_v58 = vpop.permute.xlu1 %172 }
  0xd8   :  { %vm211_vm0 = vcmp.eq.s32.totalorder %v942_v3, %v173_v58 }
  0xd9   :  { %v692_v42 = vsel %vm211_vm0, 1.0, %v921_v2 }
  0xda   :  { %v259_v8 = vadd.f32 %v692_v42, %v676_v45  ;;  %v318_v11 = vpop.permute.xlu0 %317 }
  0xdb   :  { %v197_v15 = vpop.permute.xlu1 %196 }
  0xdc   :  { %vm219_vm3 = vcmp.eq.s32.totalorder %v942_v3, %v197_v15 }
  0xdd   :  { %v700_v46 = vsel %vm219_vm3, 1.0, %v921_v2 }
  0xde   :  { %v267_v49 = vadd.f32 %v700_v46, %v684_v44 }
  0xdf   :  { %v427_v20 = vpop.permute.xlu0 %426 }
  0xe0   :  { %v415_v22 = vpop.permute.xlu1 %414  ;;  %v379_v55 = vadd.f32 %v716_v51, %v267_v49  ;;  %vm445_vm2 = vcmp.eq.s32.totalorder %v942_v3, %v427_v20 }
  0xe1   :  { %vm441_vm11 = vcmp.eq.s32.totalorder %v942_v3, %v415_v22 }
  0xe2   :  { %v730_v24 = vsel %vm441_vm11, 1.0, %v921_v2 }
  0xe3   :  { %v489_v25 = vadd.f32 %v730_v24, %v377_v23 }
  0xe5   :  { %v80_v27 = vpop.permute.xlu1 %79  ;;  %815 = vmatprep.mubr.f32.mxu1 %v489_v25 }
  0xe6   :  { %vm116_vm9 = vcmp.eq.s32.totalorder %v942_v3, %v80_v27 }
  0xe7   :  { %v677_v63 = vsel %vm116_vm9, 1.0, %v921_v2 }
  0xea   :  { %v176_v9 = vpop.permute.xlu1 %175 }
  0xeb   :  { %vm212_vm8 = vcmp.eq.s32.totalorder %v942_v3, %v176_v9  ;;  %v734_v9 = vsel %vm445_vm2, 1.0, %v921_v2 }
  0xec   :  { %v693_v56 = vsel %vm212_vm8, 1.0, %v921_v2  ;;  %vm118_vm8 = vcmp.eq.s32.totalorder %v942_v3, %v1199_v17 }
  0xed   :  { %v260_v4 = vadd.f32 %v693_v56, %v677_v63 }
  0xee   :  { %v200_v30 = vpop.permute.xlu1 %199 }
  0xef   :  { %vm220_vm11 = vcmp.eq.s32.totalorder %v942_v3, %v200_v30 }
  0xf0   :  { %v701_v5 = vsel %vm220_vm11, 1.0, %v921_v2  ;;  %vm222_vm11 = vcmp.eq.s32.totalorder %v942_v3, %v1229_v35 }
  0xf1   :  { %v268_v15 = vadd.f32 %v701_v5, %v685_v13 }
  0xf3   :  { %v418_v33 = vpop.permute.xlu1 %417 }
  0xf4   :  { %vm442_vm15 = vcmp.eq.s32.totalorder %v942_v3, %v418_v33 }
  0xf5   :  { %v731_v37 = vsel %vm442_vm15, 1.0, %v921_v2  ;;  %vm221_vm15 = vcmp.eq.s32.totalorder %v942_v3, %v1220_v32 }
  0xf6   :  { %v490_v18 = vadd.f32 %v731_v37, %v378_v36  ;;  %v702_v22 = vsel %vm221_vm15, 1.0, %v921_v2 }
  0xf8   :  { %v285_v38 = vpop.permute.xlu1 %284  ;;  %816 = vmatmul.mubr.f32.gmra.mxu1 %v490_v18  ;;  %v679_v18 = vsel %vm118_vm8, 1.0, %v921_v2 }
  0xf9   :  { %vm323_vm4 = vcmp.eq.s32.totalorder %v942_v3, %v285_v38 }
  0xfa   :  { %v708_v47 = vsel %vm323_vm4, 1.0, %v921_v2 }
  0xfb   :  { %v371_v50 = vadd.f32 %v708_v47, %v259_v8 }
  0xfc   :  { %v288_v26 = vpop.permute.xlu1 %287 }
  0xfd   :  { %vm324_vm10 = vcmp.eq.s32.totalorder %v942_v3, %v288_v26 }
  0xfe   :  { %v709_v0 = vsel %vm324_vm10, 1.0, %v921_v2 }
  0xff   :  { %v372_v7 = vadd.f32 %v709_v0, %v260_v4 }
 0x100   :  { %v312_v39 = vpop.permute.xlu1 %311 }
 0x101   :  { %vm332_vm13 = vcmp.eq.s32.totalorder %v942_v3, %v312_v39 }
 0x102   :  { %v717_v14 = vsel %vm332_vm13, 1.0, %v921_v2  ;;  %vm334_vm13 = vcmp.eq.s32.totalorder %v942_v3, %v318_v11 }
 0x103   :  { %v380_v19 = vadd.f32 %v717_v14, %v268_v15  ;;  %v719_v44 = vsel %vm334_vm13, 1.0, %v921_v2 }
 0x105   :  { %v107_v40 = vpop.permute.xlu1 %106 }
 0x106   :  { %vm125_vm0 = vcmp.eq.s32.totalorder %v942_v3, %v107_v40 }
 0x107   :  { %v686_v23 = vsel %vm125_vm0, 1.0, %v921_v2 }
 0x108   :  { %v269_v25 = vadd.f32 %v702_v22, %v686_v23 }
 0x10a   :  { %v1296_v41 = vpop.permute.xlu1 %178 }
 0x10b   :  { %vm213_vm3 = vcmp.eq.s32.totalorder %v942_v3, %v1296_v41  ;;  %v703_v41 = vsel %vm222_vm11, 1.0, %v921_v2 }
 0x10c   :  { %v694_v28 = vsel %vm213_vm3, 1.0, %v921_v2 }
 0x10d   :  { %v261_v34 = vadd.f32 %v694_v28, %v678_v1 }
 0x10f   :  { %v397_v48 = vpop.permute.xlu1 %396 }
 0x110   :  { %vm435_vm6 = vcmp.eq.s32.totalorder %v942_v3, %v397_v48 }
 0x111   :  { %v724_v52 = vsel %vm435_vm6, 1.0, %v921_v2  ;;  %vm325_vm6 = vcmp.eq.s32.totalorder %v942_v3, %v291_v62 }
 0x112   :  { %v483_v53 = vadd.f32 %v724_v52, %v371_v50  ;;  %v710_v33 = vsel %vm325_vm6, 1.0, %v921_v2 }
 0x113   :  { %v421_v54 = vpop.permute.xlu1 %420  ;;  %v373_v37 = vadd.f32 %v710_v33, %v261_v34 }
 0x114   :  { %vm443_vm7 = vcmp.eq.s32.totalorder %v942_v3, %v421_v54  ;;  %806 = vmatprep.mubr.f32.mxu0 %v483_v53 }
 0x115   :  { %v732_v57 = vsel %vm443_vm7, 1.0, %v921_v2 }
 0x116   :  { %v491_v59 = vadd.f32 %v732_v57, %v379_v55 }
 0x118   :  { %v1309_v60 = vpop.permute.xlu1 %109  ;;  %818 = vmatprep.mubr.f32.mxu1 %v491_v59 }
 0x119   :  { %vm126_vm9 = vcmp.eq.s32.totalorder %v942_v3, %v1309_v60 }
 0x11a   :  { %v687_v38 = vsel %vm126_vm9, 1.0, %v921_v2 }
 0x11b   :  { %v270_v43 = vadd.f32 %v703_v41, %v687_v38 }
 0x11d   :  { %v182_v61 = vpop.permute.xlu1 %181  ;;  %v382_v8 = vadd.f32 %v719_v44, %v270_v43 }
 0x11e   :  { %vm214_vm7 = vcmp.eq.s32.totalorder %v942_v3, %v182_v61 }
 0x11f   :  { %v695_v12 = vsel %vm214_vm7, 1.0, %v921_v2 }
 0x120   :  { %v262_v39 = vadd.f32 %v695_v12, %v679_v18 }
 0x122   :  { %v400_v6 = vpop.permute.xlu1 %399 }
 0x123   :  { %vm436_vm14 = vcmp.eq.s32.totalorder %v942_v3, %v400_v6 }
 0x124   :  { %v725_v58 = vsel %vm436_vm14, 1.0, %v921_v2 }
 0x125   :  { %v484_v16 = vadd.f32 %v725_v58, %v372_v7 }
 0x126   :  { %v424_v10 = vpop.permute.xlu1 %423 }
 0x127   :  { %vm444_vm1 = vcmp.eq.s32.totalorder %v942_v3, %v424_v10  ;;  %807 = vmatmul.mubr.f32.gmra.mxu0 %v484_v16 }
 0x128   :  { %v733_v21 = vsel %vm444_vm1, 1.0, %v921_v2 }
 0x129   :  { %v492_v24 = vadd.f32 %v733_v21, %v380_v19 }
 0x12b   :  { %v315_v32 = vpop.permute.xlu1 %314  ;;  %819 = vmatmul.mubr.f32.gmra.mxu1 %v492_v24 }
 0x12c   :  { %vm333_vm4 = vcmp.eq.s32.totalorder %v942_v3, %v315_v32 }
 0x12d   :  { %v718_v27 = vsel %vm333_vm4, 1.0, %v921_v2 }
 0x12e   :  { %v381_v30 = vadd.f32 %v718_v27, %v269_v25 }
 0x12f   :  { %v294_v31 = vpop.permute.xlu1 %293 }
 0x130   :  { %v493_v29 = vadd.f32 %v734_v9, %v381_v30  ;;  %vm326_vm10 = vcmp.eq.s32.totalorder %v942_v3, %v294_v31 }
 0x131   :  { %v711_v17 = vsel %vm326_vm10, 1.0, %v921_v2 }
 0x132   :  { %821 = vmatprep.mubr.f32.mxu1 %v493_v29  ;;  %v374_v35 = vadd.f32 %v711_v17, %v262_v39 }
 0x134   :  { %v403_v36 = vpop.permute.xlu1 %402 }
 0x135   :  { %vm437_vm12 = vcmp.eq.s32.totalorder %v942_v3, %v403_v36 }
 0x136   :  { %v726_v26 = vsel %vm437_vm12, 1.0, %v921_v2 }
 0x137   :  { %v485_v40 = vadd.f32 %v726_v26, %v373_v37 }
 0x138   :  { %v406_v42 = vpop.permute.xlu1 %405 }
 0x139   :  { %vm438_vm14 = vcmp.eq.s32.totalorder %v942_v3, %v406_v42  ;;  %809 = vmatprep.mubr.f32.mxu0 %v485_v40 }
 0x13a   :  { %v727_v45 = vsel %vm438_vm14, 1.0, %v921_v2 }
 0x13b   :  { %v486_v46 = vadd.f32 %v727_v45, %v374_v35 }
 0x13c   :  { %v430_v47 = vpop.permute.xlu1 %429 }
 0x13d   :  { %vm446_vm15 = vcmp.eq.s32.totalorder %v942_v3, %v430_v47  ;;  %810 = vmatmul.mubr.f32.gmra.mxu0 %v486_v46 }
 0x13e   :  { %v735_v48 = vsel %vm446_vm15, 1.0, %v921_v2 }
 0x13f   :  { %v494_v49 = vadd.f32 %v735_v48, %v382_v8 }
 0x141   :  { %822 = vmatmul.mubr.f32.gmra.mxu1 %v494_v49 }
 0x185   :  { %v802_v50 = vpop.f32.mrf.mxu0 }
 0x186   :  { %641 = vst [vmem:[#allocation2 + $0x8] sm:$0xff] %v802_v50 }
 0x187   :  { %v561_v51 = vpop.f32.mrf.mxu0 }
 0x188   :  { %640 = vst [vmem:[#allocation2] sm:$0xff] %v561_v51 }
 0x18e   :  { %v814_v52 = vpop.f32.mrf.mxu1 }
 0x18f   :  { %649 = vst [vmem:[#allocation2 + $0x48] sm:$0xff] %v814_v52 }
 0x190   :  { %v601_v53 = vpop.f32.mrf.mxu1 }
 0x191   :  { %648 = vst [vmem:[#allocation2 + $0x40] sm:$0xff] %v601_v53 }
 0x194   :  { %v805_v54 = vpop.f32.mrf.mxu0 }
 0x195   :  { %643 = vst [vmem:[#allocation2 + $0x18] sm:$0xff] %v805_v54 }
 0x196   :  { %v571_v55 = vpop.f32.mrf.mxu0 }
 0x197   :  { %642 = vst [vmem:[#allocation2 + $0x10] sm:$0xff] %v571_v55 }
 0x1b8   :  { %v817_v57 = vpop.f32.mrf.mxu1 }
 0x1b9   :  { %651 = vst [vmem:[#allocation2 + $0x58] sm:$0xff] %v817_v57 }
 0x1ba   :  { %v611_v3 = vpop.f32.mrf.mxu1 }
 0x1bb   :  { %650 = vst [vmem:[#allocation2 + $0x50] sm:$0xff] %v611_v3 }
 0x1e7   :  { %v808_v59 = vpop.f32.mrf.mxu0 }
 0x1e8   :  { %645 = vst [vmem:[#allocation2 + $0x28] sm:$0xff] %v808_v59 }
 0x1e9   :  { %v581_v2 = vpop.f32.mrf.mxu0 }
 0x1ea   :  { %644 = vst [vmem:[#allocation2 + $0x20] sm:$0xff] %v581_v2 }
 0x1eb   :  { %v820_v60 = vpop.f32.mrf.mxu1 }
 0x1ec   :  { %653 = vst [vmem:[#allocation2 + $0x68] sm:$0xff] %v820_v60 }
 0x1ed   :  { %v621_v61 = vpop.f32.mrf.mxu1 }
 0x1ee   :  { %652 = vst [vmem:[#allocation2 + $0x60] sm:$0xff] %v621_v61 }
 0x1fd   :  { %v811_v56 = vpop.f32.mrf.mxu0 }
 0x1fe   :  { %647 = vst [vmem:[#allocation2 + $0x38] sm:$0xff] %v811_v56 }
 0x1ff   :  { %v591_v62 = vpop.f32.mrf.mxu0 }
 0x200   :  { %646 = vst [vmem:[#allocation2 + $0x30] sm:$0xff] %v591_v62 }
 0x201   :  { %v823_v63 = vpop.f32.mrf.mxu1 }
 0x202   :  { %655 = vst [vmem:[#allocation2 + $0x78] sm:$0xff] %v823_v63 }
 0x203   :  { %v631_v0 = vpop.f32.mrf.mxu1 }
 0x204   :  { %654 = vst [vmem:[#allocation2 + $0x70] sm:$0xff] %v631_v0 }
 0x205   :  { %906 = shalt.err (!%p903_p4)
}
 0x206   :  { %s923_s18 = smov 128   ;;  %s924_s19 = smov 8  }
 0x207   :  { %667 = dma.vmem_to_hbm [thread:$0]  %s662_s16, 2048, %s1371_s2, [#allocation3], %s923_s18, %s923_s18, %s924_s19  }
 0x208   :  { %915 = dma.done.wait [#allocation3], 2048  }
 0x209   :  { %916 = vsyncadd [#allocation3], 4294965248 }
 0x20a   :  { %671 = vsyncpa [#allocation3], 1 }

</bundles_post_ra>
